<compile_context>
chip_gen: v5e
topology: v5e:2x2
jax: 0.10.0
libtpu: 0.0.40
codegen_flags: <defaults>
</compile_context>

<pallas_src>
import jax
import jax.numpy as jnp
from jax.experimental import pallas as pl
from jax.experimental.pallas import tpu as pltpu


def _mish_kernel(x_ref, o_ref):
    x = x_ref[...].astype(jnp.float32)
    # mish(x) = x * tanh(softplus(x))
    # tanh(log1p(e)) == ((1+e)^2 - 1) / ((1+e)^2 + 1) == e*(e+2) / (e*(e+2) + 2)
    # -> one exp (EUP) + cheap VPU ops, no cancellation for negative x.
    e = jnp.exp(jnp.minimum(x, 20.0))
    u = e * (e + 2.0)
    y = jnp.where(x > 20.0, x, x * (u / (u + 2.0)))
    o_ref[...] = y.astype(o_ref.dtype)


def _mish_jnp(x):
    """Fused pure-jnp Mish (same formula) for tiny / ragged-size inputs."""
    xf = x.astype(jnp.float32)
    e = jnp.exp(jnp.minimum(xf, 20.0))
    u = e * (e + 2.0)
    y = jnp.where(xf > 20.0, xf, xf * (u / (u + 2.0)))
    return y.astype(x.dtype)


_TARGET_BLOCK_BYTES = 4 << 20  # ~4 MiB/block -> 16 MiB VMEM double-buffered in+out
_MIN_GRID_STEPS = 8            # >= 4 pipelined steps per TensorCore on v7x megacore


def _choose_block_rows(rows, lane, itemsize):
    """Sublane block size: ~4 MiB blocks, >= 8 grid steps for large inputs."""
    max_rows = max(32, _TARGET_BLOCK_BYTES // (lane * itemsize))
    if rows <= max_rows:
        return rows  # single block == full row extent (always a legal block shape)
    br = min(max_rows, pl.cdiv(rows, _MIN_GRID_STEPS))
    # multiple of 32 rows: legal sublane tiling for f32/bf16/int8 alike
    br = max(32, (br // 32) * 32)
    return br


def mish(x, *, small_fallback_bytes=2 << 20):
    """Elementwise Mish for arrays of any shape (NCHW etc.)."""
    orig_shape = x.shape
    orig_dtype = x.dtype
    n = x.size
    if n == 0:
        return x
    itemsize = jnp.dtype(orig_dtype).itemsize

    # Widest lane width in {1024,512,256,128} that divides n (reshape is then
    # metadata-only, no data movement).
    lane = None
    for cand in (1024, 512, 256, 128):
        if n % cand == 0:
            lane = cand
            break

    # Ragged sizes: padding + trailing slice would each add a full HBM pass,
    # making the custom call slower than XLA's own elementwise fusion.
    # Tiny inputs: kernel launch/DMA setup dominates; XLA fusion is one pass.
    if lane is None or n * itemsize <= small_fallback_bytes:
        return _mish_jnp(x)

    rows = n // lane
    x2d = x.reshape(rows, lane)

    block_rows = _choose_block_rows(rows, lane, itemsize)
    grid = (pl.cdiv(rows, block_rows),)  # partial last block handled by Pallas masking

    out2d = pl.pallas_call(
        _mish_kernel,
        out_shape=jax.ShapeDtypeStruct((rows, lane), orig_dtype),
        grid=grid,
        in_specs=[pl.BlockSpec((block_rows, lane), lambda i: (i, 0))],
        out_specs=pl.BlockSpec((block_rows, lane), lambda i: (i, 0)),
        compiler_params=pltpu.CompilerParams(
            dimension_semantics=("parallel",),
            vmem_limit_bytes=48 << 20,  # v5e default scoped VMEM (16 MiB) is too small for 4 MiB blocks
        ),
        cost_estimate=pl.CostEstimate(
            flops=6 * n, transcendentals=n, bytes_accessed=2 * n * itemsize),
    )(x2d)

    return out2d.reshape(orig_shape)


def mish_ref(x):
    """Pure-JAX reference: x * tanh(softplus(x)) with PyTorch's threshold."""
    xf = x.astype(jnp.float32)
    sp = jnp.where(xf > 20.0, xf, jnp.log1p(jnp.exp(jnp.minimum(xf, 20.0))))
    return (xf * jnp.tanh(sp)).astype(x.dtype)


if __name__ == "__main__":
    key = jax.random.PRNGKey(0)

    # Small NCHW input from the module spec. Force the Pallas path once
    # (default dispatch would use the fused-jnp fast path for sizes this small).
    x = jax.random.normal(key, (2, 4, 16, 16), dtype=jnp.float32) * 3.0
    y = mish(x, small_fallback_bytes=0)  # force Pallas kernel
    jax.block_until_ready(y)
    y_ref = mish_ref(x)
    assert y.shape == x.shape and y.dtype == x.dtype
    assert jnp.allclose(y, y_ref, atol=1e-6, rtol=1e-5), "mismatch vs reference (pallas)"
    # Default dispatch (fused-jnp small-input path) must agree too.
    assert jnp.allclose(mish(x), y_ref, atol=1e-6, rtol=1e-5), "mismatch vs reference (fallback)"

    # Medium aligned input: exercises the multi-block pipelined grid (8 steps).
    xm = jax.random.normal(jax.random.PRNGKey(1), (2, 8, 128, 1024), dtype=jnp.float32) * 3.0
    ym = mish(xm)
    jax.block_until_ready(ym)
    assert jnp.allclose(ym, mish_ref(xm), atol=1e-6, rtol=1e-5), "medium-size mismatch"

    # Threshold-boundary / negative-tail values through the kernel itself
    # (embedded in one lane-aligned row, Pallas path forced).
    vals = jnp.array([-100.0, -30.0, -20.0, -5.0, -1e-3, 0.0, 1e-3,
                      5.0, 19.5, 20.0, 20.5, 30.0, 100.0], dtype=jnp.float32)
    xb = jnp.zeros((128,), jnp.float32).at[:vals.size].set(vals)
    yb = mish(xb, small_fallback_bytes=0)
    jax.block_until_ready(yb)
    assert jnp.allclose(yb, mish_ref(xb), atol=1e-6, rtol=1e-5), "boundary mismatch"

    # Ragged size -> fused-jnp fallback path (no pad/slice HBM copies).
    xr = jax.random.normal(jax.random.PRNGKey(2), (7, 5), dtype=jnp.float32) * 3.0
    assert jnp.allclose(mish(xr), mish_ref(xr), atol=1e-6, rtol=1e-5), "ragged mismatch"

    print("KERNEL_OK")
</pallas_src>

<mosaic_0001>
module attributes {stable_mosaic.version = 11 : i64} {
  func.func @_mish_kernel(%arg0: i32, %arg1: memref<2x1024xf32, #tpu.memory_space<vmem>>, %arg2: memref<2x1024xf32, #tpu.memory_space<vmem>>) attributes {dimension_semantics = [#tpu.dimension_semantics<parallel>], iteration_bounds = array<i64: 1>, scalar_prefetch = 0 : i64, scratch_operands = 0 : i64, tpu.core_type = #tpu.core_type<tc>, window_params = [{transform_indices = @transform_0, window_bounds = array<i64: 2, 1024>}, {transform_indices = @transform_1, window_bounds = array<i64: 2, 1024>}]} {
    %c0 = arith.constant 0 : index
    %c0_0 = arith.constant 0 : index
    %0 = vector.load %arg1[%c0, %c0_0] : memref<2x1024xf32, #tpu.memory_space<vmem>>, vector<2x1024xf32>
    %cst = arith.constant 2.000000e+01 : f32
    %1 = vector.broadcast %cst : f32 to vector<2x1024xf32>
    %2 = arith.minimumf %0, %1 : vector<2x1024xf32>
    %3 = math.exp %2 : vector<2x1024xf32>
    %cst_1 = arith.constant 2.000000e+00 : f32
    %4 = vector.broadcast %cst_1 : f32 to vector<2x1024xf32>
    %5 = arith.addf %3, %4 : vector<2x1024xf32>
    %6 = arith.mulf %3, %5 : vector<2x1024xf32>
    %cst_2 = arith.constant 2.000000e+01 : f32
    %7 = vector.broadcast %cst_2 : f32 to vector<2x1024xf32>
    %8 = arith.cmpf ogt, %0, %7 : vector<2x1024xf32>
    %cst_3 = arith.constant 2.000000e+00 : f32
    %9 = vector.broadcast %cst_3 : f32 to vector<2x1024xf32>
    %10 = arith.addf %6, %9 : vector<2x1024xf32>
    %11 = arith.divf %6, %10 : vector<2x1024xf32>
    %12 = arith.mulf %0, %11 : vector<2x1024xf32>
    %13 = arith.select %8, %0, %12 : vector<2x1024xi1>, vector<2x1024xf32>
    %c0_4 = arith.constant 0 : index
    %c0_5 = arith.constant 0 : index
    %14 = vector.load %arg2[%c0_4, %c0_5] : memref<2x1024xf32, #tpu.memory_space<vmem>>, vector<2x1024xf32>
    tpu.vector_store %arg2[%c0_4, %c0_5], %13 {strides = array<i32>} : memref<2x1024xf32, #tpu.memory_space<vmem>>, vector<2x1024xf32>,
    return
  }
  func.func @transform_0(%arg0: i32) -> (i32, i32) {
    %c0_i32 = arith.constant 0 : i32
    %c0_i32_0 = arith.constant 0 : i32
    return %arg0, %c0_i32 : i32, i32
  }
  func.func @transform_1(%arg0: i32) -> (i32, i32) {
    %c0_i32 = arith.constant 0 : i32
    %c0_i32_0 = arith.constant 0 : i32
    return %arg0, %c0_i32 : i32, i32
  }
}

</mosaic_0001>

<bundles_post_ra>
// kernel: tpu_custom_call.1
= control target key start
LH: loop header
LB: loop body
LE: loop exit
PB: predicated region body
PF: predicated region fallthrough
CT: control target
= control target key end

     0   :  { %6 = vsyncpa [#allocation3], 0  ;;  %s172_s0 = inlined_call_operand.hbm [shape: f32[2,1024], index: 0, kind: input, shape index: {}]   ;;  %s173_s1 = inlined_call_operand.hbm [shape: f32[2,1024], index: 1, kind: output, shape index: {}]  }
   0x1   :  { %7 = vsyncpa [#allocation4], 0  ;;  %s13_s8 = sshll.u32 %s172_s0, 4  ;;  %s154_s9 = smov [#allocation2]   ;;  %s14_s8 = int_to_ptr.hbm [resolvable:$true] %s13_s8 }
   0x2   :  { %s15_s10 = sshll.u32 %s154_s9, 4  ;;  %s16_s10 = int_to_ptr.vmem [resolvable:$true] %s15_s10 }
   0x3   :  { %18 = dma.hbm_to_vmem [thread:$0]  %s14_s8, 256, %s16_s10, [#allocation3]  }
   0x4   :  { %150 = dma.done.wait [#allocation3], 256  }
   0x5   :  { %151 = vsyncadd [#allocation3], 4294967040  ;;  %v23_v0 = vld [vmem:[#allocation2] sm:$0xff]  ;;  %v24_v1 = vld [vmem:[#allocation2 + $0x8] sm:$0xff]  ;;  %s155_s0 = smov [#allocation5]   ;;  %s82_s14 = sshll.u32 %s173_s1, 4  ;;  %s83_s14 = int_to_ptr.hbm [resolvable:$true] %s82_s14 }
   0x6   :  { %v25_v2 = vmin.f32 %v23_v0, 20.0  ;;  %v26_v3 = vmin.f32 %v24_v1, 20.0  ;;  %vm35_vm8 = vcmp.gt.f32.partialorder %v23_v0, 20.0  ;;  %s80_s11 = sshll.u32 %s155_s0, 4  ;;  %vm36_vm9 = vcmp.gt.f32.partialorder %v24_v1, 20.0  ;;  %s81_s11 = int_to_ptr.vmem [resolvable:$true] %s80_s11 }
   0x8   :  { %v27_v4 = vmul.f32 1.442695, %v25_v2  ;;  %v29_v5 = vmul.f32 1.442695, %v26_v3 }
   0xa   :  { %94 = vpow2.f32 %v27_v4 }
   0xb   :  { %96 = vpow2.f32 %v29_v5 }
  0x10   :  { %v95_v6 = vpop.eup %94 }
  0x11   :  { %v97_v7 = vpop.eup %96  ;;  %v31_v8 = vadd.f32 2.0, %v95_v6 }
  0x12   :  { %v32_v9 = vadd.f32 2.0, %v97_v7 }
  0x13   :  { %v33_v10 = vmul.f32 %v95_v6, %v31_v8 }
  0x14   :  { %v34_v11 = vmul.f32 %v97_v7, %v32_v9 }
  0x15   :  { %v37_v12 = vadd.f32 2.0, %v33_v10 }
  0x16   :  { %v38_v13 = vadd.f32 2.0, %v34_v11 }
  0x17   :  { %98 = vrcp.f32 %v37_v12  ;;  %vm44_vm0 = vweird.f32 %v37_v12  ;;  %v50_v17 = vand.u32 2147483648, %v37_v12  ;;  %v48_v20 = vand.u32 2147483647, %v37_v12 }
  0x18   :  { %100 = vrcp.f32 %v38_v13  ;;  %v65_v21 = vand.u32 2147483648, %v38_v13  ;;  %vm59_vm2 = vweird.f32 %v38_v13  ;;  %v63_v23 = vand.u32 2147483647, %v38_v13 }
  0x19   :  { %v51_v25 = vor.u32 1.1754944e-38, %v50_v17  ;;  %vm49_vm5 = vcmp.eq.f32.partialorder %v48_v20, 8.507059e+37 }
  0x1a   :  { %v66_v28 = vor.u32 1.1754944e-38, %v65_v21  ;;  %vm64_vm7 = vcmp.eq.f32.partialorder %v63_v23, 8.507059e+37 }
  0x1d   :  { %v99_v14 = vpop.eup %98 }
  0x1e   :  { %v101_v15 = vpop.eup %100  ;;  %v40_v16 = vmul.f32 %v99_v14, %v37_v12  ;;  %vm45_vm1 = vweird.f32 %v99_v14 }
  0x1f   :  { %v55_v18 = vmul.f32 %v101_v15, %v38_v13  ;;  %vm60_vm3 = vweird.f32 %v101_v15  ;;  %vm46_vm4 = vmor %vm44_vm0, %vm45_vm1 }
  0x20   :  { %v41_v19 = vsub.f32 1.0, %v40_v16  ;;  %vm61_vm6 = vmor %vm59_vm2, %vm60_vm3 }
  0x21   :  { %v56_v22 = vsub.f32 1.0, %v55_v18 }
  0x22   :  { %v42_v24 = vmul.f32 %v99_v14, %v41_v19 }
  0x23   :  { %v57_v26 = vmul.f32 %v101_v15, %v56_v22 }
  0x24   :  { %v43_v27 = vadd.f32 %v99_v14, %v42_v24 }
  0x25   :  { %v58_v29 = vadd.f32 %v101_v15, %v57_v26 }
  0x26   :  { %v47_v30 = vsel %vm46_vm4, %v99_v14, %v43_v27 }
  0x27   :  { %v52_v31 = vsel %vm49_vm5, %v51_v25, %v47_v30  ;;  %v62_v32 = vsel %vm61_vm6, %v101_v15, %v58_v29 }
  0x28   :  { %v53_v33 = vmul.f32 %v52_v31, %v33_v10  ;;  %v67_v34 = vsel %vm64_vm7, %v66_v28, %v62_v32 }
  0x29   :  { %v68_v35 = vmul.f32 %v67_v34, %v34_v11 }
  0x2a   :  { %v69_v36 = vmul.f32 %v53_v33, %v23_v0 }
  0x2b   :  { %v70_v37 = vmul.f32 %v68_v35, %v24_v1 }
  0x2c   :  { %v71_v38 = vsel %vm35_vm8, %v23_v0, %v69_v36 }
  0x2d   :  { %73 = vst [vmem:[#allocation5] sm:$0xff] %v71_v38  ;;  %v72_v39 = vsel %vm36_vm9, %v24_v1, %v70_v37 }
  0x2e   :  { %74 = vst [vmem:[#allocation5 + $0x8] sm:$0xff] %v72_v39 }
  0x2f   :  { %85 = dma.vmem_to_hbm [thread:$0]  %s81_s11, 256, %s83_s14, [#allocation4]  }
  0x30   :  { %152 = dma.done.wait [#allocation4], 256  }
  0x31   :  { %153 = vsyncadd [#allocation4], 4294967040 }
  0x32   :  { %90 = vsyncpa [#allocation3], 1 }
  0x33   :  { %91 = vsyncpa [#allocation4], 1 }

</bundles_post_ra>
